<compile_context>
chip_gen: v5e
topology: v5e:2x2
jax: 0.10.0
libtpu: 0.0.40
codegen_flags: <defaults>
</compile_context>

<pallas_src>
import functools

import jax
import jax.numpy as jnp
from jax.experimental import pallas as pl
from jax.experimental.pallas import tpu as pltpu


NEG_SLOPE = 0.2  # LeakyReLU negative slope from the PyTorch module


def _leaky_relu(h):
    return jnp.where(h >= 0, h, NEG_SLOPE * h)


def mlp_kernel(x_ref, w1_ref, w2_ref, w3_ref, w4_ref, bias_ref, out_ref):
    """Fused 4-layer MLP on one (block_m, nin) row tile.  Weights resident."""
    nh_p = w2_ref.shape[0]
    nout_p = w4_ref.shape[1]
    cdt = w1_ref.dtype  # compute dtype for the MXU (bf16)

    bias = bias_ref[...]            # (8, Wb) f32 packed biases, rows 0..3 used
    b1 = bias[0:1, :nh_p]
    b2 = bias[1:2, :nh_p]
    b3 = bias[2:3, :nh_p]
    b4 = bias[3:4, :nout_p]

    # Layer 1: Linear(nin -> nh) + LeakyReLU(0.2)   (bf16 cast happens in-kernel)
    h = jnp.dot(x_ref[...].astype(cdt), w1_ref[...],
                preferred_element_type=jnp.float32) + b1
    h = _leaky_relu(h)
    # Layer 2: Linear(nh -> nh) + LeakyReLU(0.2)
    h = jnp.dot(h.astype(cdt), w2_ref[...],
                preferred_element_type=jnp.float32) + b2
    h = _leaky_relu(h)
    # Layer 3: Linear(nh -> nh) + LeakyReLU(0.2)
    h = jnp.dot(h.astype(cdt), w3_ref[...],
                preferred_element_type=jnp.float32) + b3
    h = _leaky_relu(h)
    # Layer 4: Linear(nh -> nout), no activation
    out = jnp.dot(h.astype(cdt), w4_ref[...],
                  preferred_element_type=jnp.float32) + b4
    out_ref[...] = out.astype(out_ref.dtype)
    # TODO(synk): optional bf16 epilogue (bias add + LeakyReLU in bf16) for
    # v6e/v7x only — skipped; VALU is not the binding slot at these sizes.


def _round_up(n, m):
    return (n + m - 1) // m * m


def _pad2(a, rows, cols):
    return jnp.pad(a, ((0, rows - a.shape[0]), (0, cols - a.shape[1])))


def _tensorcores_per_chip():
    """Best-effort detection of 2-TC chips (v7x); 1 for v5e/v6e or unknown."""
    try:
        kind = jax.devices()[0].device_kind.lower()
    except Exception:
        return 1
    return 2 if ("v7" in kind or "7x" in kind) else 1


def _pick_block_m(n_rows, *, max_block_m=512, min_grid=1):
    """Largest row tile (multiple of 8) up to max_block_m, keeping >= min_grid steps."""
    rows8 = _round_up(max(n_rows, 1), 8)
    steps = max(min_grid, pl.cdiv(rows8, max_block_m))
    steps = max(1, min(steps, rows8 // 8))       # never more steps than 8-row tiles
    return max(8, _round_up(pl.cdiv(rows8, steps), 8))


def prepare_params(params, *, compute_dtype=jnp.bfloat16):
    """One-time weight prep: pad output dims to multiples of 128, cast to bf16,
    pack the four biases into a single (8, Wb) f32 array.  Call once at init."""
    nin, nh = params["w1"].shape
    nout = params["w4"].shape[1]
    nh_p = _round_up(nh, 128)
    nout_p = _round_up(nout, 128)
    wb = max(nh_p, nout_p)

    w1 = _pad2(params["w1"], nin, nh_p).astype(compute_dtype)   # nin stays unpadded
    w2 = _pad2(params["w2"], nh_p, nh_p).astype(compute_dtype)
    w3 = _pad2(params["w3"], nh_p, nh_p).astype(compute_dtype)
    w4 = _pad2(params["w4"], nh_p, nout_p).astype(compute_dtype)

    bias = jnp.zeros((8, wb), jnp.float32)
    bias = bias.at[0, :nh].set(params["b1"].astype(jnp.float32))
    bias = bias.at[1, :nh].set(params["b2"].astype(jnp.float32))
    bias = bias.at[2, :nh].set(params["b3"].astype(jnp.float32))
    bias = bias.at[3, :nout].set(params["b4"].astype(jnp.float32))

    return {"w1": w1, "w2": w2, "w3": w3, "w4": w4, "bias": bias}


@functools.partial(jax.jit, static_argnames=("nout", "block_m", "out_dtype"))
def _mlp_forward_impl(x, prepared, *, nout, block_m, out_dtype):
    B, nin = x.shape
    w1, w2, w3, w4 = prepared["w1"], prepared["w2"], prepared["w3"], prepared["w4"]
    bias = prepared["bias"]
    nh_p = w2.shape[0]
    nout_p = w4.shape[1]
    wb = bias.shape[1]
    assert w1.shape[0] == nin, "prepared params do not match x feature dim"

    B_p = _round_up(B, block_m)
    grid_m = B_p // block_m
    if B_p != B:  # row-pad only when needed (padded rows are sliced off below)
        x = jnp.pad(x, ((0, B_p - B), (0, 0)))

    grid_spec = pltpu.PrefetchScalarGridSpec(
        num_scalar_prefetch=0,
        grid=(grid_m,),
        in_specs=[
            # x row tile: pipelined / double-buffered across the grid.
            pl.BlockSpec((block_m, nin), lambda i: (i, 0)),
            # Weights + packed bias: constant index_map -> DMA'd once, resident.
            pl.BlockSpec((nin, nh_p),    lambda i: (0, 0)),
            pl.BlockSpec((nh_p, nh_p),   lambda i: (0, 0)),
            pl.BlockSpec((nh_p, nh_p),   lambda i: (0, 0)),
            pl.BlockSpec((nh_p, nout_p), lambda i: (0, 0)),
            pl.BlockSpec((8, wb),        lambda i: (0, 0)),
        ],
        out_specs=pl.BlockSpec((block_m, nout_p), lambda i: (i, 0)),
    )

    w_itemsize = jnp.dtype(w1.dtype).itemsize
    out_itemsize = jnp.dtype(out_dtype).itemsize
    flops = 2 * B_p * (nin * nh_p + 2 * nh_p * nh_p + nh_p * nout_p)
    bytes_accessed = (
        B_p * nin * x.dtype.itemsize
        + (w1.size + w2.size + w3.size + w4.size) * w_itemsize
        + bias.size * 4
        + B_p * nout_p * out_itemsize
    )

    out_p = pl.pallas_call(
        mlp_kernel,
        out_shape=jax.ShapeDtypeStruct((B_p, nout_p), out_dtype),
        grid_spec=grid_spec,
        compiler_params=pltpu.CompilerParams(
            # Row tiles are independent -> megacore-shardable on 2-TC chips.
            dimension_semantics=("parallel",),
            # Tiny footprint (<1 MiB weights + few-MiB row tiles); 32 MiB is
            # safe on every generation incl. v7x's 64 MiB VMEM.  Re-derive if
            # nh or block_m is grown substantially.
            vmem_limit_bytes=32 * 1024 * 1024,
        ),
        cost_estimate=pl.CostEstimate(
            flops=int(flops), transcendentals=0, bytes_accessed=int(bytes_accessed)),
    )(x, w1, w2, w3, w4, bias)

    return out_p[:B, :nout]


def mlp_forward(x, prepared, *, nout, block_m=None, out_dtype=jnp.float32):
    """x: (B, nin) f32 -> (B, nout).  `prepared` comes from prepare_params()."""
    if block_m is None:
        block_m = _pick_block_m(x.shape[0], min_grid=_tensorcores_per_chip())
    return _mlp_forward_impl(x, prepared, nout=nout, block_m=block_m,
                             out_dtype=out_dtype)


def mlp_reference(x, params):
    """Plain-JAX f32 reference of the same forward pass."""
    h = x @ params["w1"] + params["b1"]
    h = jnp.where(h >= 0, h, NEG_SLOPE * h)
    h = h @ params["w2"] + params["b2"]
    h = jnp.where(h >= 0, h, NEG_SLOPE * h)
    h = h @ params["w3"] + params["b3"]
    h = jnp.where(h >= 0, h, NEG_SLOPE * h)
    return h @ params["w4"] + params["b4"]


def init_params(key, nin, nout, nh):
    """PyTorch-style nn.Linear init: U(-1/sqrt(fan_in), 1/sqrt(fan_in))."""
    def linear(k, fan_in, fan_out):
        kw, kb = jax.random.split(k)
        bound = 1.0 / jnp.sqrt(fan_in)
        w = jax.random.uniform(kw, (fan_in, fan_out), jnp.float32, -bound, bound)
        b = jax.random.uniform(kb, (fan_out,), jnp.float32, -bound, bound)
        return w, b

    k1, k2, k3, k4 = jax.random.split(key, 4)
    w1, b1 = linear(k1, nin, nh)
    w2, b2 = linear(k2, nh, nh)
    w3, b3 = linear(k3, nh, nh)
    w4, b4 = linear(k4, nh, nout)
    return {"w1": w1, "b1": b1, "w2": w2, "b2": b2,
            "w3": w3, "b3": b3, "w4": w4, "b4": b4}


if __name__ == "__main__":
    key = jax.random.PRNGKey(0)
    k_x, k_p = jax.random.split(key)

    # Small shapes consistent with the module's use: rows of features -> MLP.
    batch_rows = 256        # e.g. batch=2 graphs x 128 items, flattened to rows
    nin, nh, nout = 32, 64, 32

    x = jax.random.normal(k_x, (batch_rows, nin), jnp.float32)
    params = init_params(k_p, nin, nout, nh)

    # One-time weight preparation (pad to lane-dense layout + bf16 cast).
    prepared = prepare_params(params)

    out = mlp_forward(x, prepared, nout=nout)
    out = jax.block_until_ready(out)

    ref = mlp_reference(x, params)
    # bf16 MXU operands with f32 accumulation -> ~1e-2-level relative error budget.
    assert out.shape == (batch_rows, nout), f"bad output shape {out.shape}"
    assert jnp.allclose(out, ref, rtol=2e-2, atol=2e-2), "MLP output mismatch"

    print("KERNEL_OK")
</pallas_src>

<mosaic_0001>
module attributes {stable_mosaic.version = 11 : i64} {
  func.func @mlp_kernel(%arg0: i32, %arg1: memref<256x32xf32, #tpu.memory_space<vmem>>, %arg2: memref<32x128xbf16, #tpu.memory_space<vmem>>, %arg3: memref<128x128xbf16, #tpu.memory_space<vmem>>, %arg4: memref<128x128xbf16, #tpu.memory_space<vmem>>, %arg5: memref<128x128xbf16, #tpu.memory_space<vmem>>, %arg6: memref<8x128xf32, #tpu.memory_space<vmem>>, %arg7: memref<256x128xf32, #tpu.memory_space<vmem>>) attributes {dimension_semantics = [#tpu.dimension_semantics<parallel>], iteration_bounds = array<i64: 1>, scalar_prefetch = 0 : i64, scratch_operands = 0 : i64, tpu.core_type = #tpu.core_type<tc>, window_params = [{transform_indices = @transform_0, window_bounds = array<i64: 256, 32>}, {pipeline_mode = #tpu.pipeline_mode<synchronous>, transform_indices = @transform_1, window_bounds = array<i64: 32, 128>}, {pipeline_mode = #tpu.pipeline_mode<synchronous>, transform_indices = @transform_2, window_bounds = array<i64: 128, 128>}, {pipeline_mode = #tpu.pipeline_mode<synchronous>, transform_indices = @transform_3, window_bounds = array<i64: 128, 128>}, {pipeline_mode = #tpu.pipeline_mode<synchronous>, transform_indices = @transform_4, window_bounds = array<i64: 128, 128>}, {pipeline_mode = #tpu.pipeline_mode<synchronous>, transform_indices = @transform_5, window_bounds = array<i64: 8, 128>}, {transform_indices = @transform_6, window_bounds = array<i64: 256, 128>}]} {
    %c0 = arith.constant 0 : index
    %c0_0 = arith.constant 0 : index
    %0 = vector.load %arg6[%c0, %c0_0] : memref<8x128xf32, #tpu.memory_space<vmem>>, vector<8x128xf32>
    %1 = vector.extract_strided_slice %0 {offsets = [0, 0], sizes = [1, 128], strides = [1, 1]} : vector<8x128xf32> to vector<1x128xf32>
    %2 = vector.extract_strided_slice %0 {offsets = [1, 0], sizes = [1, 128], strides = [1, 1]} : vector<8x128xf32> to vector<1x128xf32>
    %3 = vector.extract_strided_slice %0 {offsets = [2, 0], sizes = [1, 128], strides = [1, 1]} : vector<8x128xf32> to vector<1x128xf32>
    %4 = vector.extract_strided_slice %0 {offsets = [3, 0], sizes = [1, 128], strides = [1, 1]} : vector<8x128xf32> to vector<1x128xf32>
    %c0_1 = arith.constant 0 : index
    %c0_2 = arith.constant 0 : index
    %5 = vector.load %arg1[%c0_1, %c0_2] : memref<256x32xf32, #tpu.memory_space<vmem>>, vector<256x32xf32>
    %6 = arith.truncf %5 : vector<256x32xf32> to vector<256x32xbf16>
    %c0_3 = arith.constant 0 : index
    %c0_4 = arith.constant 0 : index
    %7 = vector.load %arg2[%c0_3, %c0_4] : memref<32x128xbf16, #tpu.memory_space<vmem>>, vector<32x128xbf16>
    %cst = arith.constant dense<0.000000e+00> : vector<256x128xf32>
    %8 = tpu.matmul %6, %7, %cst {dimension_numbers = #tpu.dot_dimension_numbers<[1], [0], [0], [1], [0, 0, 1, 1], [], []>} : vector<256x32xbf16>, vector<32x128xbf16>, vector<256x128xf32> -> vector<256x128xf32>
    %9 = vector.broadcast %1 : vector<1x128xf32> to vector<256x128xf32>
    %10 = arith.addf %8, %9 : vector<256x128xf32>
    %cst_5 = arith.constant 0.000000e+00 : f32
    %11 = vector.broadcast %cst_5 : f32 to vector<256x128xf32>
    %12 = arith.cmpf oge, %10, %11 : vector<256x128xf32>
    %cst_6 = arith.constant 2.000000e-01 : f32
    %13 = vector.broadcast %cst_6 : f32 to vector<256x128xf32>
    %14 = arith.mulf %13, %10 : vector<256x128xf32>
    %15 = arith.select %12, %10, %14 : vector<256x128xi1>, vector<256x128xf32>
    %16 = arith.truncf %15 : vector<256x128xf32> to vector<256x128xbf16>
    %c0_7 = arith.constant 0 : index
    %c0_8 = arith.constant 0 : index
    %17 = vector.load %arg3[%c0_7, %c0_8] : memref<128x128xbf16, #tpu.memory_space<vmem>>, vector<128x128xbf16>
    %cst_9 = arith.constant dense<0.000000e+00> : vector<256x128xf32>
    %18 = tpu.matmul %16, %17, %cst_9 {dimension_numbers = #tpu.dot_dimension_numbers<[1], [0], [0], [1], [0, 0, 1, 1], [], []>} : vector<256x128xbf16>, vector<128x128xbf16>, vector<256x128xf32> -> vector<256x128xf32>
    %19 = vector.broadcast %2 : vector<1x128xf32> to vector<256x128xf32>
    %20 = arith.addf %18, %19 : vector<256x128xf32>
    %cst_10 = arith.constant 0.000000e+00 : f32
    %21 = vector.broadcast %cst_10 : f32 to vector<256x128xf32>
    %22 = arith.cmpf oge, %20, %21 : vector<256x128xf32>
    %cst_11 = arith.constant 2.000000e-01 : f32
    %23 = vector.broadcast %cst_11 : f32 to vector<256x128xf32>
    %24 = arith.mulf %23, %20 : vector<256x128xf32>
    %25 = arith.select %22, %20, %24 : vector<256x128xi1>, vector<256x128xf32>
    %26 = arith.truncf %25 : vector<256x128xf32> to vector<256x128xbf16>
    %c0_12 = arith.constant 0 : index
    %c0_13 = arith.constant 0 : index
    %27 = vector.load %arg4[%c0_12, %c0_13] : memref<128x128xbf16, #tpu.memory_space<vmem>>, vector<128x128xbf16>
    %cst_14 = arith.constant dense<0.000000e+00> : vector<256x128xf32>
    %28 = tpu.matmul %26, %27, %cst_14 {dimension_numbers = #tpu.dot_dimension_numbers<[1], [0], [0], [1], [0, 0, 1, 1], [], []>} : vector<256x128xbf16>, vector<128x128xbf16>, vector<256x128xf32> -> vector<256x128xf32>
    %29 = vector.broadcast %3 : vector<1x128xf32> to vector<256x128xf32>
    %30 = arith.addf %28, %29 : vector<256x128xf32>
    %cst_15 = arith.constant 0.000000e+00 : f32
    %31 = vector.broadcast %cst_15 : f32 to vector<256x128xf32>
    %32 = arith.cmpf oge, %30, %31 : vector<256x128xf32>
    %cst_16 = arith.constant 2.000000e-01 : f32
    %33 = vector.broadcast %cst_16 : f32 to vector<256x128xf32>
    %34 = arith.mulf %33, %30 : vector<256x128xf32>
    %35 = arith.select %32, %30, %34 : vector<256x128xi1>, vector<256x128xf32>
    %36 = arith.truncf %35 : vector<256x128xf32> to vector<256x128xbf16>
    %c0_17 = arith.constant 0 : index
    %c0_18 = arith.constant 0 : index
    %37 = vector.load %arg5[%c0_17, %c0_18] : memref<128x128xbf16, #tpu.memory_space<vmem>>, vector<128x128xbf16>
    %cst_19 = arith.constant dense<0.000000e+00> : vector<256x128xf32>
    %38 = tpu.matmul %36, %37, %cst_19 {dimension_numbers = #tpu.dot_dimension_numbers<[1], [0], [0], [1], [0, 0, 1, 1], [], []>} : vector<256x128xbf16>, vector<128x128xbf16>, vector<256x128xf32> -> vector<256x128xf32>
    %39 = vector.broadcast %4 : vector<1x128xf32> to vector<256x128xf32>
    %40 = arith.addf %38, %39 : vector<256x128xf32>
    %c0_20 = arith.constant 0 : index
    %c0_21 = arith.constant 0 : index
    %41 = vector.load %arg7[%c0_20, %c0_21] : memref<256x128xf32, #tpu.memory_space<vmem>>, vector<256x128xf32>
    tpu.vector_store %arg7[%c0_20, %c0_21], %40 {strides = array<i32>} : memref<256x128xf32, #tpu.memory_space<vmem>>, vector<256x128xf32>,
    return
  }
  func.func @transform_0(%arg0: i32) -> (i32, i32) {
    %c0_i32 = arith.constant 0 : i32
    %c0_i32_0 = arith.constant 0 : i32
    return %arg0, %c0_i32 : i32, i32
  }
  func.func @transform_1(%arg0: i32) -> (i32, i32) {
    %c0_i32 = arith.constant 0 : i32
    %c0_i32_0 = arith.constant 0 : i32
    %c0_i32_1 = arith.constant 0 : i32
    return %c0_i32, %c0_i32_0 : i32, i32
  }
  func.func @transform_2(%arg0: i32) -> (i32, i32) {
    %c0_i32 = arith.constant 0 : i32
    %c0_i32_0 = arith.constant 0 : i32
    %c0_i32_1 = arith.constant 0 : i32
    return %c0_i32, %c0_i32_0 : i32, i32
  }
  func.func @transform_3(%arg0: i32) -> (i32, i32) {
    %c0_i32 = arith.constant 0 : i32
    %c0_i32_0 = arith.constant 0 : i32
    %c0_i32_1 = arith.constant 0 : i32
    return %c0_i32, %c0_i32_0 : i32, i32
  }
  func.func @transform_4(%arg0: i32) -> (i32, i32) {
    %c0_i32 = arith.constant 0 : i32
    %c0_i32_0 = arith.constant 0 : i32
    %c0_i32_1 = arith.constant 0 : i32
    return %c0_i32, %c0_i32_0 : i32, i32
  }
  func.func @transform_5(%arg0: i32) -> (i32, i32) {
    %c0_i32 = arith.constant 0 : i32
    %c0_i32_0 = arith.constant 0 : i32
    %c0_i32_1 = arith.constant 0 : i32
    return %c0_i32, %c0_i32_0 : i32, i32
  }
  func.func @transform_6(%arg0: i32) -> (i32, i32) {
    %c0_i32 = arith.constant 0 : i32
    %c0_i32_0 = arith.constant 0 : i32
    return %arg0, %c0_i32 : i32, i32
  }
}

</mosaic_0001>

<bundles_post_ra>
// kernel: _mlp_forward_impl.1
= control target key start
LH: loop header
LB: loop body
LE: loop exit
PB: predicated region body
PF: predicated region fallthrough
CT: control target
= control target key end

     0   :  { %vm90_vm0 = vcmask 261120   ;;  %s1677_s1 = inlined_call_operand.vmem [shape: bf16[32,128], index: 1, kind: input, shape index: {}]   ;;  %s1678_s0 = inlined_call_operand.vmem [shape: f32[256,32], index: 0, kind: input, shape index: {}]   ;;  %s1679_s2 = inlined_call_operand.vmem [shape: bf16[128,128], index: 2, kind: input, shape index: {}]   ;;  %s1680_s5 = inlined_call_operand.vmem [shape: f32[8,128], index: 5, kind: input, shape index: {}]   ;;  %s1681_s3 = inlined_call_operand.vmem [shape: bf16[128,128], index: 3, kind: input, shape index: {}]   ;;  %s1682_s4 = inlined_call_operand.vmem [shape: bf16[128,128], index: 4, kind: input, shape index: {}]   ;;  %s1683_s6 = inlined_call_operand.vmem [shape: f32[256,128], index: 6, kind: output, shape index: {}]  }
   0x1   :  { %v1183_v0 = vld [vmem:[%s1677_s1 + $0x8] sm:$0xff]  ;;  %v1182_v1 = vld [vmem:[%s1677_s1] sm:$0xff]  ;;  %v27_v5 = vld [vmem:[%s1678_s0 + $0x10] sm:$0xff] }
   0x2   :  { %145 = vmatpush.bf16.msra.mxu0 %v1183_v0  ;;  %v25_v2 = vld [vmem:[%s1678_s0] sm:$0xff]  ;;  %v26_v3 = vld [vmem:[%s1678_s0 + $0x8] sm:$0xff]  ;;  %v28_v6 = vld [vmem:[%s1678_s0 + $0x18] sm:$0xff] }
   0x3   :  { %v57_v4 = vpack.c.bf16 %v26_v3, %v25_v2  ;;  %v58_v7 = vpack.c.bf16 %v28_v6, %v27_v5  ;;  %v29_v8 = vld [vmem:[%s1678_s0 + $0x20] sm:$0xff]  ;;  %v30_v9 = vld [vmem:[%s1678_s0 + $0x28] sm:$0xff]  ;;  %v31_v11 = vld [vmem:[%s1678_s0 + $0x30] sm:$0xff] }
   0x4   :  { %v59_v10 = vpack.c.bf16 %v30_v9, %v29_v8  ;;  %v32_v12 = vld [vmem:[%s1678_s0 + $0x38] sm:$0xff]  ;;  %v33_v14 = vld [vmem:[%s1678_s0 + $0x40] sm:$0xff]  ;;  %v34_v15 = vld [vmem:[%s1678_s0 + $0x48] sm:$0xff] }
   0x5   :  { %v60_v13 = vpack.c.bf16 %v32_v12, %v31_v11  ;;  %v61_v16 = vpack.c.bf16 %v34_v15, %v33_v14  ;;  %v1191_v17 = vld [vmem:[%s1679_s2 + $0x38] sm:$0xff]  ;;  %v35_v18 = vld [vmem:[%s1678_s0 + $0x50] sm:$0xff]  ;;  %v1189_v22 = vld [vmem:[%s1679_s2 + $0x28] sm:$0xff] }
   0x6   :  { %146 = vmatpush.bf16.msra.mxu0 %v1182_v1  ;;  %405 = vmatpush.bf16.msra.mxu1 %v1191_v17  ;;  %v36_v19 = vld [vmem:[%s1678_s0 + $0x58] sm:$0xff]  ;;  %v1190_v21 = vld [vmem:[%s1679_s2 + $0x30] sm:$0xff]  ;;  %v1188_v23 = vld [vmem:[%s1679_s2 + $0x20] sm:$0xff] }
   0x7   :  { %v62_v20 = vpack.c.bf16 %v36_v19, %v35_v18  ;;  %v37_v24 = vld [vmem:[%s1678_s0 + $0x60] sm:$0xff]  ;;  %v38_v25 = vld [vmem:[%s1678_s0 + $0x68] sm:$0xff]  ;;  %v1187_v27 = vld [vmem:[%s1679_s2 + $0x18] sm:$0xff] }
   0x8   :  { %v63_v26 = vpack.c.bf16 %v38_v25, %v37_v24  ;;  %v1186_v28 = vld [vmem:[%s1679_s2 + $0x10] sm:$0xff]  ;;  %v1185_v29 = vld [vmem:[%s1679_s2 + $0x8] sm:$0xff]  ;;  %v1184_v30 = vld [vmem:[%s1679_s2] sm:$0xff] }
   0x9   :  { %1070 = vmatmul.msk.bf16.vlgmr.msra.gmra.mxu0 %vm90_vm0, %v57_v4  ;;  %v39_v31 = vld [vmem:[%s1678_s0 + $0x70] sm:$0xff]  ;;  %v40_v32 = vld [vmem:[%s1678_s0 + $0x78] sm:$0xff]  ;;  %v41_v34 = vld [vmem:[%s1678_s0 + $0x80] sm:$0xff] }
   0xa   :  { %406 = vmatpush.bf16.msra.mxu1 %v1190_v21  ;;  %v64_v33 = vpack.c.bf16 %v40_v32, %v39_v31  ;;  %v42_v35 = vld [vmem:[%s1678_s0 + $0x88] sm:$0xff]  ;;  %v1339_v36 = vld [vmem:[%s1680_s5] sm:$0xff]  ;;  %v43_v45 = vld [vmem:[%s1678_s0 + $0x90] sm:$0xff] }
   0xb   :  { %v65_v37 = vpack.c.bf16 %v42_v35, %v41_v34  ;;  %v1342_v39 = vperm.slane %v1339_v36, 0  ;;  %v44_v46 = vld [vmem:[%s1678_s0 + $0x98] sm:$0xff]  ;;  %v45_v57 = vld [vmem:[%s1678_s0 + $0xa0] sm:$0xff]  ;;  %v46_v58 = vld [vmem:[%s1678_s0 + $0xa8] sm:$0xff] }
   0xc   :  { %v66_v50 = vpack.c.bf16 %v44_v46, %v43_v45  ;;  %v67_v62 = vpack.c.bf16 %v46_v58, %v45_v57  ;;  %v47_v5 = vld [vmem:[%s1678_s0 + $0xb0] sm:$0xff]  ;;  %v48_v6 = vld [vmem:[%s1678_s0 + $0xb8] sm:$0xff]  ;;  %v49_v17 = vld [vmem:[%s1678_s0 + $0xc0] sm:$0xff] }
   0xd   :  { %v50_v18 = vld [vmem:[%s1678_s0 + $0xc8] sm:$0xff] }
   0xe   :  { %407 = vmatpush.bf16.msra.mxu1 %v1189_v22  ;;  %v69_v22 = vpack.c.bf16 %v50_v18, %v49_v17  ;;  %v54_v45 = vld [vmem:[%s1678_s0 + $0xe8] sm:$0xff] }
  0x12   :  { %408 = vmatpush.bf16.msra.mxu1 %v1188_v23 }
  0x16   :  { %409 = vmatpush.bf16.msra.mxu1 %v1187_v27 }
  0x19   :  { %1071 = vmatmul.msk.bf16.gmra.mxu0 %vm90_vm0, %v58_v7 }
  0x1a   :  { %410 = vmatpush.bf16.msra.mxu1 %v1186_v28 }
  0x1e   :  { %411 = vmatpush.bf16.msra.mxu1 %v1185_v29  ;;  %v51_v29 = vld [vmem:[%s1678_s0 + $0xd0] sm:$0xff] }
  0x22   :  { %412 = vmatpush.bf16.msra.mxu1 %v1184_v30  ;;  %v52_v30 = vld [vmem:[%s1678_s0 + $0xd8] sm:$0xff] }
  0x23   :  { %v70_v34 = vpack.c.bf16 %v52_v30, %v51_v29 }
  0x29   :  { %1072 = vmatmul.msk.bf16.gmra.mxu0 %vm90_vm0, %v59_v10  ;;  %v68_v10 = vpack.c.bf16 %v48_v6, %v47_v5 }
  0x39   :  { %1073 = vmatmul.msk.bf16.gmra.mxu0 %vm90_vm0, %v60_v13 }
  0x49   :  { %1074 = vmatmul.msk.bf16.gmra.mxu0 %vm90_vm0, %v61_v16 }
  0x59   :  { %1075 = vmatmul.msk.bf16.gmra.mxu0 %vm90_vm0, %v62_v20 }
  0x69   :  { %1076 = vmatmul.msk.bf16.gmra.mxu0 %vm90_vm0, %v63_v26 }
  0x79   :  { %1077 = vmatmul.msk.bf16.gmra.mxu0 %vm90_vm0, %v64_v33 }
  0x86   :  { %v148_v38 = vpop.f32.mrf.mxu0 }
  0x87   :  { %v149_v40 = vadd.f32 %v148_v38, %v1342_v39 }
  0x89   :  { %1078 = vmatmul.msk.bf16.gmra.mxu0 %vm90_vm0, %v65_v37  ;;  %v260_v42 = vmul.f32 0.2, %v149_v40  ;;  %vm228_vm1 = vcmp.ge.f32.partialorder %v149_v40, 0.0 }
  0x8b   :  { %v292_v47 = vsel %vm228_vm1, %v149_v40, %v260_v42 }
  0x8e   :  { %v150_v41 = vpop.f32.mrf.mxu0 }
  0x8f   :  { %v151_v43 = vadd.f32 %v150_v41, %v1342_v39 }
  0x91   :  { %v261_v44 = vmul.f32 0.2, %v151_v43  ;;  %vm229_vm2 = vcmp.ge.f32.partialorder %v151_v43, 0.0 }
  0x93   :  { %v293_v48 = vsel %vm229_vm2, %v151_v43, %v261_v44  ;;  %v1199_v43 = vld [vmem:[%s1681_s3 + $0x38] sm:$0xff]  ;;  %v53_v44 = vld [vmem:[%s1678_s0 + $0xe0] sm:$0xff] }
  0x94   :  { %v324_v49 = vpack.c.bf16 %v293_v48, %v292_v47  ;;  %671 = vmatpush.bf16.msra.mxu2 %v1199_v43 }
  0x96   :  { %v153_v51 = vpop.f32.mrf.mxu0  ;;  %413 = vmatmul.bf16.vlgmr.msra.gmra.mxu1 %v324_v49  ;;  %v71_v49 = vpack.c.bf16 %v54_v45, %v53_v44 }
  0x97   :  { %v154_v52 = vadd.f32 %v153_v51, %v1342_v39  ;;  %v1198_v51 = vld [vmem:[%s1681_s3 + $0x30] sm:$0xff] }
  0x98   :  { %672 = vmatpush.bf16.msra.mxu2 %v1198_v51 }
  0x99   :  { %1079 = vmatmul.msk.bf16.gmra.mxu0 %vm90_vm0, %v66_v50  ;;  %v262_v54 = vmul.f32 0.2, %v154_v52  ;;  %vm230_vm3 = vcmp.ge.f32.partialorder %v154_v52, 0.0 }
  0x9b   :  { %v294_v59 = vsel %vm230_vm3, %v154_v52, %v262_v54  ;;  %v1197_v52 = vld [vmem:[%s1681_s3 + $0x28] sm:$0xff] }
  0x9c   :  { %673 = vmatpush.bf16.msra.mxu2 %v1197_v52 }
  0x9e   :  { %v155_v53 = vpop.f32.mrf.mxu0 }
  0x9f   :  { %v156_v55 = vadd.f32 %v155_v53, %v1342_v39 }
  0xa1   :  { %v263_v56 = vmul.f32 0.2, %v156_v55  ;;  %vm231_vm4 = vcmp.ge.f32.partialorder %v156_v55, 0.0 }
  0xa3   :  { %v295_v60 = vsel %vm231_vm4, %v156_v55, %v263_v56  ;;  %v1196_v55 = vld [vmem:[%s1681_s3 + $0x20] sm:$0xff] }
  0xa4   :  { %v325_v61 = vpack.c.bf16 %v295_v60, %v294_v59  ;;  %674 = vmatpush.bf16.msra.mxu2 %v1196_v55  ;;  %v55_v59 = vld [vmem:[%s1678_s0 + $0xf0] sm:$0xff]  ;;  %v56_v60 = vld [vmem:[%s1678_s0 + $0xf8] sm:$0xff] }
  0xa6   :  { %v158_v63 = vpop.f32.mrf.mxu0  ;;  %418 = vmatmul.bf16.gmra.mxu1 %v325_v61  ;;  %v1195_v61 = vld [vmem:[%s1681_s3 + $0x18] sm:$0xff] }
  0xa7   :  { %v159_v0 = vadd.f32 %v158_v63, %v1342_v39 }
  0xa8   :  { %675 = vmatpush.bf16.msra.mxu2 %v1195_v61 }
  0xa9   :  { %1080 = vmatmul.msk.bf16.gmra.mxu0 %vm90_vm0, %v67_v62  ;;  %v264_v2 = vmul.f32 0.2, %v159_v0  ;;  %vm232_vm5 = vcmp.ge.f32.partialorder %v159_v0, 0.0 }
  0xab   :  { %v296_v7 = vsel %vm232_vm5, %v159_v0, %v264_v2 }
  0xae   :  { %v160_v1 = vpop.f32.mrf.mxu0 }
  0xaf   :  { %v161_v3 = vadd.f32 %v160_v1, %v1342_v39  ;;  %v72_v1 = vpack.c.bf16 %v56_v60, %v55_v59 }
  0xb1   :  { %v265_v4 = vmul.f32 0.2, %v161_v3  ;;  %vm233_vm6 = vcmp.ge.f32.partialorder %v161_v3, 0.0 }
  0xb3   :  { %v297_v8 = vsel %vm233_vm6, %v161_v3, %v265_v4  ;;  %v1194_v3 = vld [vmem:[%s1681_s3 + $0x10] sm:$0xff]  ;;  %v1193_v4 = vld [vmem:[%s1681_s3 + $0x8] sm:$0xff] }
  0xb4   :  { %v326_v9 = vpack.c.bf16 %v297_v8, %v296_v7  ;;  %676 = vmatpush.bf16.msra.mxu2 %v1194_v3  ;;  %v1192_v7 = vld [vmem:[%s1681_s3] sm:$0xff] }
  0xb6   :  { %v163_v11 = vpop.f32.mrf.mxu0  ;;  %423 = vmatmul.bf16.gmra.mxu1 %v326_v9 }
  0xb7   :  { %v164_v12 = vadd.f32 %v163_v11, %v1342_v39 }
  0xb8   :  { %677 = vmatpush.bf16.msra.mxu2 %v1193_v4 }
  0xb9   :  { %1081 = vmatmul.msk.bf16.gmra.mxu0 %vm90_vm0, %v68_v10  ;;  %v266_v14 = vmul.f32 0.2, %v164_v12  ;;  %vm234_vm7 = vcmp.ge.f32.partialorder %v164_v12, 0.0 }
  0xbb   :  { %v298_v19 = vsel %vm234_vm7, %v164_v12, %v266_v14 }
  0xbc   :  { %678 = vmatpush.bf16.msra.mxu2 %v1192_v7 }
  0xbe   :  { %v165_v13 = vpop.f32.mrf.mxu0 }
  0xbf   :  { %v166_v15 = vadd.f32 %v165_v13, %v1342_v39 }
  0xc1   :  { %v267_v16 = vmul.f32 0.2, %v166_v15  ;;  %vm235_vm8 = vcmp.ge.f32.partialorder %v166_v15, 0.0 }
  0xc3   :  { %v299_v20 = vsel %vm235_vm8, %v166_v15, %v267_v16 }
  0xc4   :  { %v327_v21 = vpack.c.bf16 %v299_v20, %v298_v19 }
  0xc6   :  { %v168_v23 = vpop.f32.mrf.mxu0  ;;  %428 = vmatmul.bf16.gmra.mxu1 %v327_v21 }
  0xc7   :  { %v169_v24 = vadd.f32 %v168_v23, %v1342_v39  ;;  %v1437_v23 = vperm.slane %v1339_v36, 1 }
  0xc9   :  { %1082 = vmatmul.msk.bf16.gmra.mxu0 %vm90_vm0, %v69_v22  ;;  %v268_v26 = vmul.f32 0.2, %v169_v24  ;;  %vm236_vm9 = vcmp.ge.f32.partialorder %v169_v24, 0.0 }
  0xcb   :  { %v300_v31 = vsel %vm236_vm9, %v169_v24, %v268_v26 }
  0xce   :  { %v170_v25 = vpop.f32.mrf.mxu0 }
  0xcf   :  { %v171_v27 = vadd.f32 %v170_v25, %v1342_v39 }
  0xd1   :  { %v269_v28 = vmul.f32 0.2, %v171_v27  ;;  %vm237_vm10 = vcmp.ge.f32.partialorder %v171_v27, 0.0 }
  0xd3   :  { %v301_v32 = vsel %vm237_vm10, %v171_v27, %v269_v28 }
  0xd4   :  { %v328_v33 = vpack.c.bf16 %v301_v32, %v300_v31 }
  0xd6   :  { %v173_v35 = vpop.f32.mrf.mxu0  ;;  %433 = vmatmul.bf16.gmra.mxu1 %v328_v33 }
  0xd7   :  { %v174_v37 = vadd.f32 %v173_v35, %v1342_v39 }
  0xd9   :  { %1083 = vmatmul.msk.bf16.gmra.mxu0 %vm90_vm0, %v70_v34  ;;  %v270_v40 = vmul.f32 0.2, %v174_v37  ;;  %vm238_vm11 = vcmp.ge.f32.partialorder %v174_v37, 0.0 }
  0xdb   :  { %v302_v46 = vsel %vm238_vm11, %v174_v37, %v270_v40 }
  0xde   :  { %v175_v38 = vpop.f32.mrf.mxu0 }
  0xdf   :  { %v176_v41 = vadd.f32 %v175_v38, %v1342_v39 }
  0xe1   :  { %v271_v42 = vmul.f32 0.2, %v176_v41  ;;  %vm239_vm12 = vcmp.ge.f32.partialorder %v176_v41, 0.0 }
  0xe3   :  { %v303_v47 = vsel %vm239_vm12, %v176_v41, %v271_v42 }
  0xe4   :  { %v329_v48 = vpack.c.bf16 %v303_v47, %v302_v46 }
  0xe6   :  { %v178_v50 = vpop.f32.mrf.mxu0  ;;  %438 = vmatmul.bf16.gmra.mxu1 %v329_v48 }
  0xe7   :  { %v179_v53 = vadd.f32 %v178_v50, %v1342_v39 }
  0xe9   :  { %1084 = vmatmul.msk.bf16.gmra.mxu0 %vm90_vm0, %v71_v49  ;;  %v272_v56 = vmul.f32 0.2, %v179_v53  ;;  %vm240_vm13 = vcmp.ge.f32.partialorder %v179_v53, 0.0 }
  0xeb   :  { %v304_v62 = vsel %vm240_vm13, %v179_v53, %v272_v56 }
  0xee   :  { %v180_v54 = vpop.f32.mrf.mxu0 }
  0xef   :  { %v181_v57 = vadd.f32 %v180_v54, %v1342_v39 }
  0xf1   :  { %v273_v58 = vmul.f32 0.2, %v181_v57  ;;  %vm241_vm14 = vcmp.ge.f32.partialorder %v181_v57, 0.0 }
  0xf3   :  { %v305_v63 = vsel %vm241_vm14, %v181_v57, %v273_v58 }
  0xf4   :  { %v330_v0 = vpack.c.bf16 %v305_v63, %v304_v62 }
  0xf6   :  { %v183_v2 = vpop.f32.mrf.mxu0  ;;  %443 = vmatmul.bf16.gmra.mxu1 %v330_v0 }
  0xf7   :  { %v184_v5 = vadd.f32 %v183_v2, %v1342_v39 }
  0xf9   :  { %1085 = vmatmul.msk.bf16.gmra.mxu0 %vm90_vm0, %v72_v1  ;;  %v274_v8 = vmul.f32 0.2, %v184_v5  ;;  %vm242_vm15 = vcmp.ge.f32.partialorder %v184_v5, 0.0 }
  0xfb   :  { %v306_v11 = vsel %vm242_vm15, %v184_v5, %v274_v8 }
  0xfe   :  { %v185_v6 = vpop.f32.mrf.mxu0 }
  0xff   :  { %v186_v9 = vadd.f32 %v185_v6, %v1342_v39 }
 0x101   :  { %v275_v10 = vmul.f32 0.2, %v186_v9  ;;  %vm243_vm1 = vcmp.ge.f32.partialorder %v186_v9, 0.0 }
 0x103   :  { %v307_v12 = vsel %vm243_vm1, %v186_v9, %v275_v10 }
 0x104   :  { %v331_v13 = vpack.c.bf16 %v307_v12, %v306_v11 }
 0x106   :  { %v188_v14 = vpop.f32.mrf.mxu0  ;;  %448 = vmatmul.bf16.gmra.mxu1 %v331_v13 }
 0x107   :  { %v189_v15 = vadd.f32 %v188_v14, %v1342_v39 }
 0x109   :  { %v276_v17 = vmul.f32 0.2, %v189_v15  ;;  %vm244_vm0 = vcmp.ge.f32.partialorder %v189_v15, 0.0 }
 0x10b   :  { %v308_v21 = vsel %vm244_vm0, %v189_v15, %v276_v17 }
 0x10e   :  { %v190_v16 = vpop.f32.mrf.mxu0 }
 0x10f   :  { %v191_v18 = vadd.f32 %v190_v16, %v1342_v39 }
 0x111   :  { %v277_v19 = vmul.f32 0.2, %v191_v18  ;;  %vm245_vm2 = vcmp.ge.f32.partialorder %v191_v18, 0.0 }
 0x113   :  { %v414_v20 = vpop.f32.mrf.mxu1  ;;  %v309_v22 = vsel %vm245_vm2, %v191_v18, %v277_v19 }
 0x114   :  { %v332_v24 = vpack.c.bf16 %v309_v22, %v308_v21  ;;  %v415_v26 = vadd.f32 %v414_v20, %v1437_v23 }
 0x116   :  { %v193_v25 = vpop.f32.mrf.mxu0  ;;  %453 = vmatmul.bf16.gmra.mxu1 %v332_v24  ;;  %v526_v29 = vmul.f32 0.2, %v415_v26  ;;  %vm494_vm3 = vcmp.ge.f32.partialorder %v415_v26, 0.0 }
 0x117   :  { %v194_v27 = vadd.f32 %v193_v25, %v1342_v39 }
 0x118   :  { %v558_v35 = vsel %vm494_vm3, %v415_v26, %v526_v29 }
 0x119   :  { %v278_v33 = vmul.f32 0.2, %v194_v27  ;;  %vm246_vm5 = vcmp.ge.f32.partialorder %v194_v27, 0.0 }
 0x11b   :  { %v416_v28 = vpop.f32.mrf.mxu1  ;;  %v310_v42 = vsel %vm246_vm5, %v194_v27, %v278_v33 }
 0x11c   :  { %v417_v30 = vadd.f32 %v416_v28, %v1437_v23 }
 0x11e   :  { %v527_v31 = vmul.f32 0.2, %v417_v30  ;;  %v195_v32 = vpop.f32.mrf.mxu0  ;;  %vm495_vm4 = vcmp.ge.f32.partialorder %v417_v30, 0.0 }
 0x11f   :  { %v196_v34 = vadd.f32 %v195_v32, %v1342_v39 }
 0x120   :  { %v559_v37 = vsel %vm495_vm4, %v417_v30, %v527_v31 }
 0x121   :  { %v279_v38 = vmul.f32 0.2, %v196_v34  ;;  %v590_v40 = vpack.c.bf16 %v559_v37, %v558_v35  ;;  %vm247_vm6 = vcmp.ge.f32.partialorder %v196_v34, 0.0 }
 0x123   :  { %v419_v41 = vpop.f32.mrf.mxu1  ;;  %679 = vmatmul.bf16.vlgmr.msra.gmra.mxu2 %v590_v40  ;;  %v311_v43 = vsel %vm247_vm6, %v196_v34, %v279_v38 }
 0x124   :  { %v333_v44 = vpack.c.bf16 %v311_v43, %v310_v42  ;;  %v420_v46 = vadd.f32 %v419_v41, %v1437_v23 }
 0x126   :  { %v198_v45 = vpop.f32.mrf.mxu0  ;;  %458 = vmatmul.bf16.gmra.mxu1 %v333_v44  ;;  %v528_v49 = vmul.f32 0.2, %v420_v46  ;;  %vm496_vm7 = vcmp.ge.f32.partialorder %v420_v46, 0.0 }
 0x127   :  { %v199_v47 = vadd.f32 %v198_v45, %v1342_v39 }
 0x128   :  { %v560_v55 = vsel %vm496_vm7, %v420_v46, %v528_v49 }
 0x129   :  { %v280_v53 = vmul.f32 0.2, %v199_v47  ;;  %vm248_vm9 = vcmp.ge.f32.partialorder %v199_v47, 0.0 }
 0x12b   :  { %v421_v48 = vpop.f32.mrf.mxu1  ;;  %v312_v60 = vsel %vm248_vm9, %v199_v47, %v280_v53 }
 0x12c   :  { %v422_v50 = vadd.f32 %v421_v48, %v1437_v23 }
 0x12e   :  { %v529_v51 = vmul.f32 0.2, %v422_v50  ;;  %v200_v52 = vpop.f32.mrf.mxu0  ;;  %vm497_vm8 = vcmp.ge.f32.partialorder %v422_v50, 0.0 }
 0x12f   :  { %v201_v54 = vadd.f32 %v200_v52, %v1342_v39 }
 0x130   :  { %v561_v56 = vsel %vm497_vm8, %v422_v50, %v529_v51 }
 0x131   :  { %v281_v57 = vmul.f32 0.2, %v201_v54  ;;  %v591_v58 = vpack.c.bf16 %v561_v56, %v560_v55  ;;  %vm249_vm10 = vcmp.ge.f32.partialorder %v201_v54, 0.0 }
 0x133   :  { %v424_v59 = vpop.f32.mrf.mxu1  ;;  %684 = vmatmul.bf16.gmra.mxu2 %v591_v58  ;;  %v313_v61 = vsel %vm249_vm10, %v201_v54, %v281_v57 }
 0x134   :  { %v334_v62 = vpack.c.bf16 %v313_v61, %v312_v60  ;;  %v425_v0 = vadd.f32 %v424_v59, %v1437_v23 }
 0x136   :  { %v203_v63 = vpop.f32.mrf.mxu0  ;;  %463 = vmatmul.bf16.gmra.mxu1 %v334_v62  ;;  %v530_v3 = vmul.f32 0.2, %v425_v0  ;;  %vm498_vm11 = vcmp.ge.f32.partialorder %v425_v0, 0.0 }
 0x137   :  { %v204_v1 = vadd.f32 %v203_v63, %v1342_v39 }
 0x138   :  { %v562_v9 = vsel %vm498_vm11, %v425_v0, %v530_v3 }
 0x139   :  { %v282_v7 = vmul.f32 0.2, %v204_v1  ;;  %vm250_vm13 = vcmp.ge.f32.partialorder %v204_v1, 0.0 }
 0x13b   :  { %v426_v2 = vpop.f32.mrf.mxu1  ;;  %v314_v14 = vsel %vm250_vm13, %v204_v1, %v282_v7 }
 0x13c   :  { %v427_v4 = vadd.f32 %v426_v2, %v1437_v23 }
 0x13e   :  { %v531_v5 = vmul.f32 0.2, %v427_v4  ;;  %v205_v6 = vpop.f32.mrf.mxu0  ;;  %vm499_vm12 = vcmp.ge.f32.partialorder %v427_v4, 0.0 }
 0x13f   :  { %v206_v8 = vadd.f32 %v205_v6, %v1342_v39 }
 0x140   :  { %v563_v10 = vsel %vm499_vm12, %v427_v4, %v531_v5 }
 0x141   :  { %v283_v11 = vmul.f32 0.2, %v206_v8  ;;  %v592_v12 = vpack.c.bf16 %v563_v10, %v562_v9  ;;  %vm251_vm14 = vcmp.ge.f32.partialorder %v206_v8, 0.0  ;;  %v1207_v10 = vld [vmem:[%s1682_s4 + $0x38] sm:$0xff] }
 0x142   :  { %937 = vmatpush.bf16.msra.mxu3 %v1207_v10 }
 0x143   :  { %v429_v13 = vpop.f32.mrf.mxu1  ;;  %689 = vmatmul.bf16.gmra.mxu2 %v592_v12  ;;  %v315_v15 = vsel %vm251_vm14, %v206_v8, %v283_v11 }
 0x144   :  { %v335_v16 = vpack.c.bf16 %v315_v15, %v314_v14  ;;  %v430_v18 = vadd.f32 %v429_v13, %v1437_v23  ;;  %v1206_v13 = vld [vmem:[%s1682_s4 + $0x30] sm:$0xff] }
 0x146   :  { %v208_v17 = vpop.f32.mrf.mxu0  ;;  %468 = vmatmul.bf16.gmra.mxu1 %v335_v16  ;;  %v532_v21 = vmul.f32 0.2, %v430_v18  ;;  %vm500_vm15 = vcmp.ge.f32.partialorder %v430_v18, 0.0  ;;  %938 = vmatpush.bf16.msra.mxu3 %v1206_v13 }
 0x147   :  { %v209_v19 = vadd.f32 %v208_v17, %v1342_v39 }
 0x148   :  { %v564_v28 = vsel %vm500_vm15, %v430_v18, %v532_v21  ;;  %v1205_v18 = vld [vmem:[%s1682_s4 + $0x28] sm:$0xff] }
 0x149   :  { %v284_v26 = vmul.f32 0.2, %v209_v19  ;;  %vm252_vm0 = vcmp.ge.f32.partialorder %v209_v19, 0.0 }
 0x14a   :  { %939 = vmatpush.bf16.msra.mxu3 %v1205_v18 }
 0x14b   :  { %v431_v20 = vpop.f32.mrf.mxu1  ;;  %v316_v33 = vsel %vm252_vm0, %v209_v19, %v284_v26 }
 0x14c   :  { %v432_v22 = vadd.f32 %v431_v20, %v1437_v23 }
 0x14e   :  { %v533_v24 = vmul.f32 0.2, %v432_v22  ;;  %v210_v25 = vpop.f32.mrf.mxu0  ;;  %vm501_vm1 = vcmp.ge.f32.partialorder %v432_v22, 0.0 }
 0x14f   :  { %v211_v27 = vadd.f32 %v210_v25, %v1342_v39 }
 0x150   :  { %v565_v29 = vsel %vm501_vm1, %v432_v22, %v533_v24 }
 0x151   :  { %vm253_vm2 = vcmp.ge.f32.partialorder %v211_v27, 0.0  ;;  %v285_v30 = vmul.f32 0.2, %v211_v27  ;;  %v593_v31 = vpack.c.bf16 %v565_v29, %v564_v28  ;;  %v1204_v28 = vld [vmem:[%s1682_s4 + $0x20] sm:$0xff] }
 0x152   :  { %940 = vmatpush.bf16.msra.mxu3 %v1204_v28 }
 0x153   :  { %v434_v32 = vpop.f32.mrf.mxu1  ;;  %694 = vmatmul.bf16.gmra.mxu2 %v593_v31  ;;  %v317_v34 = vsel %vm253_vm2, %v211_v27, %v285_v30 }
 0x154   :  { %v336_v35 = vpack.c.bf16 %v317_v34, %v316_v33  ;;  %v435_v38 = vadd.f32 %v434_v32, %v1437_v23  ;;  %v1202_v34 = vld [vmem:[%s1682_s4 + $0x10] sm:$0xff] }
 0x156   :  { %v213_v37 = vpop.f32.mrf.mxu0  ;;  %473 = vmatmul.bf16.gmra.mxu1 %v336_v35  ;;  %v534_v42 = vmul.f32 0.2, %v435_v38  ;;  %vm502_vm3 = vcmp.ge.f32.partialorder %v435_v38, 0.0 }
 0x157   :  { %v214_v40 = vadd.f32 %v213_v37, %v1342_v39 }
 0x158   :  { %v566_v48 = vsel %vm502_vm3, %v435_v38, %v534_v42 }
 0x159   :  { %v286_v46 = vmul.f32 0.2, %v214_v40  ;;  %vm254_vm5 = vcmp.ge.f32.partialorder %v214_v40, 0.0 }
 0x15b   :  { %v436_v41 = vpop.f32.mrf.mxu1  ;;  %v318_v53 = vsel %vm254_vm5, %v214_v40, %v286_v46  ;;  %v1201_v40 = vld [vmem:[%s1682_s4 + $0x8] sm:$0xff] }
 0x15c   :  { %v437_v43 = vadd.f32 %v436_v41, %v1437_v23 }
 0x15e   :  { %v535_v44 = vmul.f32 0.2, %v437_v43  ;;  %v215_v45 = vpop.f32.mrf.mxu0  ;;  %vm503_vm4 = vcmp.ge.f32.partialorder %v437_v43, 0.0 }
 0x15f   :  { %v216_v47 = vadd.f32 %v215_v45, %v1342_v39  ;;  %v1200_v45 = vld [vmem:[%s1682_s4] sm:$0xff] }
 0x160   :  { %v567_v49 = vsel %vm503_vm4, %v437_v43, %v535_v44 }
 0x161   :  { %vm255_vm6 = vcmp.ge.f32.partialorder %v216_v47, 0.0  ;;  %v287_v50 = vmul.f32 0.2, %v216_v47  ;;  %v594_v51 = vpack.c.bf16 %v567_v49, %v566_v48 }
 0x163   :  { %v439_v52 = vpop.f32.mrf.mxu1  ;;  %699 = vmatmul.bf16.gmra.mxu2 %v594_v51  ;;  %v319_v54 = vsel %vm255_vm6, %v216_v47, %v287_v50 }
 0x164   :  { %v337_v55 = vpack.c.bf16 %v319_v54, %v318_v53  ;;  %v440_v57 = vadd.f32 %v439_v52, %v1437_v23 }
 0x166   :  { %v218_v56 = vpop.f32.mrf.mxu0  ;;  %478 = vmatmul.bf16.gmra.mxu1 %v337_v55  ;;  %v536_v60 = vmul.f32 0.2, %v440_v57  ;;  %vm504_vm7 = vcmp.ge.f32.partialorder %v440_v57, 0.0 }
 0x167   :  { %v219_v58 = vadd.f32 %v218_v56, %v1342_v39 }
 0x168   :  { %v568_v2 = vsel %vm504_vm7, %v440_v57, %v536_v60  ;;  %v1496_v57 = vperm.slane %v1339_v36, 2 }
 0x169   :  { %v288_v0 = vmul.f32 0.2, %v219_v58  ;;  %vm256_vm9 = vcmp.ge.f32.partialorder %v219_v58, 0.0 }
 0x16b   :  { %v441_v59 = vpop.f32.mrf.mxu1  ;;  %v320_v7 = vsel %vm256_vm9, %v219_v58, %v288_v0 }
 0x16c   :  { %v442_v61 = vadd.f32 %v441_v59, %v1437_v23 }
 0x16e   :  { %v537_v62 = vmul.f32 0.2, %v442_v61  ;;  %v220_v63 = vpop.f32.mrf.mxu0  ;;  %vm505_vm8 = vcmp.ge.f32.partialorder %v442_v61, 0.0 }
 0x16f   :  { %v221_v1 = vadd.f32 %v220_v63, %v1342_v39 }
 0x170   :  { %v569_v3 = vsel %vm505_vm8, %v442_v61, %v537_v62 }
 0x171   :  { %vm257_vm10 = vcmp.ge.f32.partialorder %v221_v1, 0.0  ;;  %v289_v4 = vmul.f32 0.2, %v221_v1  ;;  %v595_v5 = vpack.c.bf16 %v569_v3, %v568_v2 }
 0x173   :  { %v444_v6 = vpop.f32.mrf.mxu1  ;;  %704 = vmatmul.bf16.gmra.mxu2 %v595_v5  ;;  %v321_v8 = vsel %vm257_vm10, %v221_v1, %v289_v4 }
 0x174   :  { %v338_v9 = vpack.c.bf16 %v321_v8, %v320_v7  ;;  %v445_v12 = vadd.f32 %v444_v6, %v1437_v23 }
 0x176   :  { %v223_v11 = vpop.f32.mrf.mxu0  ;;  %483 = vmatmul.bf16.gmra.mxu1 %v338_v9  ;;  %v538_v16 = vmul.f32 0.2, %v445_v12  ;;  %vm506_vm11 = vcmp.ge.f32.partialorder %v445_v12, 0.0 }
 0x177   :  { %v224_v14 = vadd.f32 %v223_v11, %v1342_v39 }
 0x178   :  { %v570_v24 = vsel %vm506_vm11, %v445_v12, %v538_v16 }
 0x179   :  { %v290_v21 = vmul.f32 0.2, %v224_v14  ;;  %vm258_vm13 = vcmp.ge.f32.partialorder %v224_v14, 0.0 }
 0x17b   :  { %v446_v15 = vpop.f32.mrf.mxu1  ;;  %v322_v30 = vsel %vm258_vm13, %v224_v14, %v290_v21 }
 0x17c   :  { %v447_v17 = vadd.f32 %v446_v15, %v1437_v23 }
 0x17e   :  { %v539_v19 = vmul.f32 0.2, %v447_v17  ;;  %v225_v20 = vpop.f32.mrf.mxu0  ;;  %vm507_vm12 = vcmp.ge.f32.partialorder %v447_v17, 0.0 }
 0x17f   :  { %v226_v22 = vadd.f32 %v225_v20, %v1342_v39  ;;  %v1203_v39 = vld [vmem:[%s1682_s4 + $0x18] sm:$0xff] }
 0x180   :  { %v571_v25 = vsel %vm507_vm12, %v447_v17, %v539_v19  ;;  %941 = vmatpush.bf16.msra.mxu3 %v1203_v39 }
 0x181   :  { %vm259_vm14 = vcmp.ge.f32.partialorder %v226_v22, 0.0  ;;  %v291_v26 = vmul.f32 0.2, %v226_v22  ;;  %v596_v27 = vpack.c.bf16 %v571_v25, %v570_v24 }
 0x183   :  { %v449_v29 = vpop.f32.mrf.mxu1  ;;  %709 = vmatmul.bf16.gmra.mxu2 %v596_v27  ;;  %v323_v31 = vsel %vm259_vm14, %v226_v22, %v291_v26 }
 0x184   :  { %v339_v32 = vpack.c.bf16 %v323_v31, %v322_v30  ;;  %v450_v33 = vadd.f32 %v449_v29, %v1437_v23  ;;  %942 = vmatpush.bf16.msra.mxu3 %v1202_v34 }
 0x186   :  { %488 = vmatmul.bf16.gmra.mxu1 %v339_v32  ;;  %v540_v37 = vmul.f32 0.2, %v450_v33  ;;  %vm508_vm15 = vcmp.ge.f32.partialorder %v450_v33, 0.0 }
 0x188   :  { %943 = vmatpush.bf16.msra.mxu3 %v1201_v40  ;;  %v572_v42 = vsel %vm508_vm15, %v450_v33, %v540_v37 }
 0x18b   :  { %v451_v35 = vpop.f32.mrf.mxu1 }
 0x18c   :  { %v452_v38 = vadd.f32 %v451_v35, %v1437_v23  ;;  %944 = vmatpush.bf16.msra.mxu3 %v1200_v45 }
 0x18e   :  { %v541_v41 = vmul.f32 0.2, %v452_v38  ;;  %vm509_vm1 = vcmp.ge.f32.partialorder %v452_v38, 0.0 }
 0x190   :  { %v573_v43 = vsel %vm509_vm1, %v452_v38, %v541_v41 }
 0x191   :  { %v597_v44 = vpack.c.bf16 %v573_v43, %v572_v42 }
 0x193   :  { %v454_v46 = vpop.f32.mrf.mxu1  ;;  %714 = vmatmul.bf16.gmra.mxu2 %v597_v44 }
 0x194   :  { %v455_v47 = vadd.f32 %v454_v46, %v1437_v23 }
 0x196   :  { %v542_v49 = vmul.f32 0.2, %v455_v47  ;;  %vm510_vm0 = vcmp.ge.f32.partialorder %v455_v47, 0.0 }
 0x198   :  { %v574_v52 = vsel %vm510_vm0, %v455_v47, %v542_v49 }
 0x19b   :  { %v456_v48 = vpop.f32.mrf.mxu1 }
 0x19c   :  { %v457_v50 = vadd.f32 %v456_v48, %v1437_v23 }
 0x19e   :  { %v543_v51 = vmul.f32 0.2, %v457_v50  ;;  %vm511_vm2 = vcmp.ge.f32.partialorder %v457_v50, 0.0 }
 0x1a0   :  { %v575_v53 = vsel %vm511_vm2, %v457_v50, %v543_v51 }
 0x1a1   :  { %v598_v54 = vpack.c.bf16 %v575_v53, %v574_v52 }
 0x1a3   :  { %v459_v55 = vpop.f32.mrf.mxu1  ;;  %719 = vmatmul.bf16.gmra.mxu2 %v598_v54 }
 0x1a4   :  { %v460_v58 = vadd.f32 %v459_v55, %v1437_v23 }
 0x1a6   :  { %v680_v56 = vpop.f32.mrf.mxu2  ;;  %v544_v61 = vmul.f32 0.2, %v460_v58  ;;  %vm512_vm3 = vcmp.ge.f32.partialorder %v460_v58, 0.0 }
 0x1a7   :  { %v681_v59 = vadd.f32 %v680_v56, %v1496_v57 }
 0x1a8   :  { %v576_v3 = vsel %vm512_vm3, %v460_v58, %v544_v61 }
 0x1a9   :  { %v792_v1 = vmul.f32 0.2, %v681_v59  ;;  %vm760_vm5 = vcmp.ge.f32.partialorder %v681_v59, 0.0 }
 0x1ab   :  { %v461_v60 = vpop.f32.mrf.mxu1  ;;  %v824_v7 = vsel %vm760_vm5, %v681_v59, %v792_v1 }
 0x1ac   :  { %v462_v62 = vadd.f32 %v461_v60, %v1437_v23 }
 0x1ae   :  { %v545_v63 = vmul.f32 0.2, %v462_v62  ;;  %v682_v0 = vpop.f32.mrf.mxu2  ;;  %vm513_vm4 = vcmp.ge.f32.partialorder %v462_v62, 0.0 }
 0x1af   :  { %v683_v2 = vadd.f32 %v682_v0, %v1496_v57 }
 0x1b0   :  { %v577_v4 = vsel %vm513_vm4, %v462_v62, %v545_v63 }
 0x1b1   :  { %v793_v36 = vmul.f32 0.2, %v683_v2  ;;  %v599_v5 = vpack.c.bf16 %v577_v4, %v576_v3  ;;  %vm761_vm6 = vcmp.ge.f32.partialorder %v683_v2, 0.0 }
 0x1b3   :  { %v464_v6 = vpop.f32.mrf.mxu1  ;;  %724 = vmatmul.bf16.gmra.mxu2 %v599_v5  ;;  %v825_v8 = vsel %vm761_vm6, %v683_v2, %v793_v36 }
 0x1b4   :  { %v856_v9 = vpack.c.bf16 %v825_v8, %v824_v7  ;;  %v465_v11 = vadd.f32 %v464_v6, %v1437_v23 }
 0x1b6   :  { %v685_v10 = vpop.f32.mrf.mxu2  ;;  %945 = vmatmul.bf16.vlgmr.msra.gmra.mxu3 %v856_v9  ;;  %v546_v14 = vmul.f32 0.2, %v465_v11  ;;  %vm514_vm7 = vcmp.ge.f32.partialorder %v465_v11, 0.0 }
 0x1b7   :  { %v686_v12 = vadd.f32 %v685_v10, %v1496_v57 }
 0x1b8   :  { %v578_v20 = vsel %vm514_vm7, %v465_v11, %v546_v14 }
 0x1b9   :  { %v794_v18 = vmul.f32 0.2, %v686_v12  ;;  %vm762_vm9 = vcmp.ge.f32.partialorder %v686_v12, 0.0 }
 0x1bb   :  { %v466_v13 = vpop.f32.mrf.mxu1  ;;  %v826_v26 = vsel %vm762_vm9, %v686_v12, %v794_v18 }
 0x1bc   :  { %v467_v15 = vadd.f32 %v466_v13, %v1437_v23 }
 0x1be   :  { %v547_v16 = vmul.f32 0.2, %v467_v15  ;;  %v687_v17 = vpop.f32.mrf.mxu2  ;;  %vm515_vm8 = vcmp.ge.f32.partialorder %v467_v15, 0.0 }
 0x1bf   :  { %v688_v19 = vadd.f32 %v687_v17, %v1496_v57 }
 0x1c0   :  { %v579_v21 = vsel %vm515_vm8, %v467_v15, %v547_v16 }
 0x1c1   :  { %v795_v22 = vmul.f32 0.2, %v688_v19  ;;  %v600_v24 = vpack.c.bf16 %v579_v21, %v578_v20  ;;  %vm763_vm10 = vcmp.ge.f32.partialorder %v688_v19, 0.0 }
 0x1c3   :  { %v469_v25 = vpop.f32.mrf.mxu1  ;;  %729 = vmatmul.bf16.gmra.mxu2 %v600_v24  ;;  %v827_v27 = vsel %vm763_vm10, %v688_v19, %v795_v22 }
 0x1c4   :  { %v857_v28 = vpack.c.bf16 %v827_v27, %v826_v26  ;;  %v470_v30 = vadd.f32 %v469_v25, %v1437_v23 }
 0x1c6   :  { %v690_v29 = vpop.f32.mrf.mxu2  ;;  %950 = vmatmul.bf16.gmra.mxu3 %v857_v28  ;;  %v548_v39 = vmul.f32 0.2, %v470_v30  ;;  %vm516_vm11 = vcmp.ge.f32.partialorder %v470_v30, 0.0 }
 0x1c7   :  { %v691_v31 = vadd.f32 %v690_v29, %v1496_v57 }
 0x1c8   :  { %v580_v40 = vsel %vm516_vm11, %v470_v30, %v548_v39 }
 0x1c9   :  { %v796_v37 = vmul.f32 0.2, %v691_v31  ;;  %vm764_vm13 = vcmp.ge.f32.partialorder %v691_v31, 0.0 }
 0x1cb   :  { %v471_v32 = vpop.f32.mrf.mxu1  ;;  %v828_v45 = vsel %vm764_vm13, %v691_v31, %v796_v37 }
 0x1cc   :  { %v472_v33 = vadd.f32 %v471_v32, %v1437_v23 }
 0x1ce   :  { %v549_v34 = vmul.f32 0.2, %v472_v33  ;;  %v692_v35 = vpop.f32.mrf.mxu2  ;;  %vm517_vm12 = vcmp.ge.f32.partialorder %v472_v33, 0.0 }
 0x1cf   :  { %v693_v38 = vadd.f32 %v692_v35, %v1496_v57 }
 0x1d0   :  { %v581_v41 = vsel %vm517_vm12, %v472_v33, %v549_v34 }
 0x1d1   :  { %v797_v42 = vmul.f32 0.2, %v693_v38  ;;  %v601_v43 = vpack.c.bf16 %v581_v41, %v580_v40  ;;  %vm765_vm14 = vcmp.ge.f32.partialorder %v693_v38, 0.0 }
 0x1d3   :  { %v474_v44 = vpop.f32.mrf.mxu1  ;;  %734 = vmatmul.bf16.gmra.mxu2 %v601_v43  ;;  %v829_v46 = vsel %vm765_vm14, %v693_v38, %v797_v42 }
 0x1d4   :  { %v858_v47 = vpack.c.bf16 %v829_v46, %v828_v45  ;;  %v475_v49 = vadd.f32 %v474_v44, %v1437_v23 }
 0x1d6   :  { %v695_v48 = vpop.f32.mrf.mxu2  ;;  %955 = vmatmul.bf16.gmra.mxu3 %v858_v47  ;;  %v550_v52 = vmul.f32 0.2, %v475_v49  ;;  %vm518_vm15 = vcmp.ge.f32.partialorder %v475_v49, 0.0 }
 0x1d7   :  { %v696_v50 = vadd.f32 %v695_v48, %v1496_v57 }
 0x1d8   :  { %v582_v59 = vsel %vm518_vm15, %v475_v49, %v550_v52 }
 0x1d9   :  { %v798_v56 = vmul.f32 0.2, %v696_v50  ;;  %vm766_vm0 = vcmp.ge.f32.partialorder %v696_v50, 0.0 }
 0x1db   :  { %v476_v51 = vpop.f32.mrf.mxu1  ;;  %v830_v0 = vsel %vm766_vm0, %v696_v50, %v798_v56 }
 0x1dc   :  { %v477_v53 = vadd.f32 %v476_v51, %v1437_v23 }
 0x1de   :  { %vm519_vm1 = vcmp.ge.f32.partialorder %v477_v53, 0.0  ;;  %v551_v54 = vmul.f32 0.2, %v477_v53  ;;  %v697_v55 = vpop.f32.mrf.mxu2 }
 0x1df   :  { %v698_v58 = vadd.f32 %v697_v55, %v1496_v57 }
 0x1e0   :  { %v583_v60 = vsel %vm519_vm1, %v477_v53, %v551_v54 }
 0x1e1   :  { %v799_v61 = vmul.f32 0.2, %v698_v58  ;;  %v602_v62 = vpack.c.bf16 %v583_v60, %v582_v59  ;;  %vm767_vm2 = vcmp.ge.f32.partialorder %v698_v58, 0.0 }
 0x1e3   :  { %v479_v63 = vpop.f32.mrf.mxu1  ;;  %739 = vmatmul.bf16.gmra.mxu2 %v602_v62  ;;  %v831_v1 = vsel %vm767_vm2, %v698_v58, %v799_v61 }
 0x1e4   :  { %v859_v2 = vpack.c.bf16 %v831_v1, %v830_v0  ;;  %v480_v4 = vadd.f32 %v479_v63, %v1437_v23 }
 0x1e6   :  { %v700_v3 = vpop.f32.mrf.mxu2  ;;  %960 = vmatmul.bf16.gmra.mxu3 %v859_v2  ;;  %v552_v6 = vmul.f32 0.2, %v480_v4  ;;  %vm520_vm3 = vcmp.ge.f32.partialorder %v480_v4, 0.0 }
 0x1e7   :  { %v701_v36 = vadd.f32 %v700_v3, %v1496_v57 }
 0x1e8   :  { %v584_v12 = vsel %vm520_vm3, %v480_v4, %v552_v6 }
 0x1e9   :  { %v800_v10 = vmul.f32 0.2, %v701_v36  ;;  %vm768_vm5 = vcmp.ge.f32.partialorder %v701_v36, 0.0 }
 0x1eb   :  { %v481_v5 = vpop.f32.mrf.mxu1  ;;  %v832_v17 = vsel %vm768_vm5, %v701_v36, %v800_v10 }
 0x1ec   :  { %v482_v7 = vadd.f32 %v481_v5, %v1437_v23 }
 0x1ee   :  { %vm521_vm4 = vcmp.ge.f32.partialorder %v482_v7, 0.0  ;;  %v553_v8 = vmul.f32 0.2, %v482_v7  ;;  %v702_v9 = vpop.f32.mrf.mxu2 }
 0x1ef   :  { %v703_v11 = vadd.f32 %v702_v9, %v1496_v57 }
 0x1f0   :  { %v585_v13 = vsel %vm521_vm4, %v482_v7, %v553_v8 }
 0x1f1   :  { %v801_v14 = vmul.f32 0.2, %v703_v11  ;;  %v603_v15 = vpack.c.bf16 %v585_v13, %v584_v12  ;;  %vm769_vm6 = vcmp.ge.f32.partialorder %v703_v11, 0.0 }
 0x1f3   :  { %v484_v16 = vpop.f32.mrf.mxu1  ;;  %744 = vmatmul.bf16.gmra.mxu2 %v603_v15  ;;  %v833_v18 = vsel %vm769_vm6, %v703_v11, %v801_v14  ;;  %v1208_v11 = vld [vmem:[%s1680_s5] sm:$0xff] }
 0x1f4   :  { %v860_v19 = vpack.c.bf16 %v833_v18, %v832_v17  ;;  %v485_v21 = vadd.f32 %v484_v16, %v1437_v23  ;;  %v1533_v12 = vperm.slane %v1208_v11, 3 }
 0x1f6   :  { %v705_v20 = vpop.f32.mrf.mxu2  ;;  %965 = vmatmul.bf16.gmra.mxu3 %v860_v19  ;;  %v554_v25 = vmul.f32 0.2, %v485_v21  ;;  %vm522_vm7 = vcmp.ge.f32.partialorder %v485_v21, 0.0 }
 0x1f7   :  { %v706_v22 = vadd.f32 %v705_v20, %v1496_v57 }
 0x1f8   :  { %v586_v31 = vsel %vm522_vm7, %v485_v21, %v554_v25 }
 0x1f9   :  { %v802_v29 = vmul.f32 0.2, %v706_v22  ;;  %vm770_vm9 = vcmp.ge.f32.partialorder %v706_v22, 0.0 }
 0x1fb   :  { %v486_v24 = vpop.f32.mrf.mxu1  ;;  %v834_v35 = vsel %vm770_vm9, %v706_v22, %v802_v29 }
 0x1fc   :  { %v487_v26 = vadd.f32 %v486_v24, %v1437_v23 }
 0x1fe   :  { %vm523_vm8 = vcmp.ge.f32.partialorder %v487_v26, 0.0  ;;  %v555_v27 = vmul.f32 0.2, %v487_v26  ;;  %v707_v28 = vpop.f32.mrf.mxu2 }
 0x1ff   :  { %v708_v30 = vadd.f32 %v707_v28, %v1496_v57 }
 0x200   :  { %v587_v32 = vsel %vm523_vm8, %v487_v26, %v555_v27 }
 0x201   :  { %v803_v39 = vmul.f32 0.2, %v708_v30  ;;  %v604_v33 = vpack.c.bf16 %v587_v32, %v586_v31  ;;  %vm771_vm10 = vcmp.ge.f32.partialorder %v708_v30, 0.0 }
 0x203   :  { %v489_v34 = vpop.f32.mrf.mxu1  ;;  %749 = vmatmul.bf16.gmra.mxu2 %v604_v33  ;;  %v835_v37 = vsel %vm771_vm10, %v708_v30, %v803_v39 }
 0x204   :  { %v861_v38 = vpack.c.bf16 %v835_v37, %v834_v35  ;;  %v490_v41 = vadd.f32 %v489_v34, %v1437_v23 }
 0x206   :  { %v710_v40 = vpop.f32.mrf.mxu2  ;;  %970 = vmatmul.bf16.gmra.mxu3 %v861_v38  ;;  %v556_v44 = vmul.f32 0.2, %v490_v41  ;;  %vm524_vm11 = vcmp.ge.f32.partialorder %v490_v41, 0.0 }
 0x207   :  { %v711_v42 = vadd.f32 %v710_v40, %v1496_v57 }
 0x208   :  { %v588_v50 = vsel %vm524_vm11, %v490_v41, %v556_v44 }
 0x209   :  { %v804_v48 = vmul.f32 0.2, %v711_v42  ;;  %vm772_vm13 = vcmp.ge.f32.partialorder %v711_v42, 0.0 }
 0x20b   :  { %v491_v43 = vpop.f32.mrf.mxu1  ;;  %v836_v54 = vsel %vm772_vm13, %v711_v42, %v804_v48 }
 0x20c   :  { %v492_v45 = vadd.f32 %v491_v43, %v1437_v23 }
 0x20e   :  { %vm525_vm12 = vcmp.ge.f32.partialorder %v492_v45, 0.0  ;;  %v557_v46 = vmul.f32 0.2, %v492_v45  ;;  %v712_v47 = vpop.f32.mrf.mxu2 }
 0x20f   :  { %v713_v49 = vadd.f32 %v712_v47, %v1496_v57 }
 0x210   :  { %v589_v51 = vsel %vm525_vm12, %v492_v45, %v557_v46 }
 0x211   :  { %v805_v52 = vmul.f32 0.2, %v713_v49  ;;  %v605_v53 = vpack.c.bf16 %v589_v51, %v588_v50  ;;  %vm773_vm14 = vcmp.ge.f32.partialorder %v713_v49, 0.0 }
 0x213   :  { %754 = vmatmul.bf16.gmra.mxu2 %v605_v53  ;;  %v837_v55 = vsel %vm773_vm14, %v713_v49, %v805_v52 }
 0x214   :  { %v862_v56 = vpack.c.bf16 %v837_v55, %v836_v54 }
 0x216   :  { %v715_v58 = vpop.f32.mrf.mxu2  ;;  %975 = vmatmul.bf16.gmra.mxu3 %v862_v56 }
 0x217   :  { %v716_v23 = vadd.f32 %v715_v58, %v1496_v57 }
 0x219   :  { %v806_v60 = vmul.f32 0.2, %v716_v23  ;;  %vm774_vm15 = vcmp.ge.f32.partialorder %v716_v23, 0.0 }
 0x21b   :  { %v838_v63 = vsel %vm774_vm15, %v716_v23, %v806_v60 }
 0x21e   :  { %v717_v59 = vpop.f32.mrf.mxu2 }
 0x21f   :  { %v718_v61 = vadd.f32 %v717_v59, %v1496_v57 }
 0x221   :  { %v807_v62 = vmul.f32 0.2, %v718_v61  ;;  %vm775_vm1 = vcmp.ge.f32.partialorder %v718_v61, 0.0 }
 0x223   :  { %v839_v0 = vsel %vm775_vm1, %v718_v61, %v807_v62 }
 0x224   :  { %v863_v1 = vpack.c.bf16 %v839_v0, %v838_v63 }
 0x226   :  { %v720_v2 = vpop.f32.mrf.mxu2  ;;  %980 = vmatmul.bf16.gmra.mxu3 %v863_v1 }
 0x227   :  { %v721_v3 = vadd.f32 %v720_v2, %v1496_v57 }
 0x229   :  { %v808_v36 = vmul.f32 0.2, %v721_v3  ;;  %vm776_vm0 = vcmp.ge.f32.partialorder %v721_v3, 0.0 }
 0x22b   :  { %v840_v7 = vsel %vm776_vm0, %v721_v3, %v808_v36 }
 0x22e   :  { %v722_v4 = vpop.f32.mrf.mxu2 }
 0x22f   :  { %v723_v5 = vadd.f32 %v722_v4, %v1496_v57 }
 0x231   :  { %v809_v6 = vmul.f32 0.2, %v723_v5  ;;  %vm777_vm2 = vcmp.ge.f32.partialorder %v723_v5, 0.0 }
 0x233   :  { %v841_v8 = vsel %vm777_vm2, %v723_v5, %v809_v6 }
 0x234   :  { %v864_v9 = vpack.c.bf16 %v841_v8, %v840_v7 }
 0x236   :  { %v725_v10 = vpop.f32.mrf.mxu2  ;;  %985 = vmatmul.bf16.gmra.mxu3 %v864_v9 }
 0x237   :  { %v726_v15 = vadd.f32 %v725_v10, %v1496_v57 }
 0x239   :  { %v946_v13 = vpop.f32.mrf.mxu3  ;;  %v810_v17 = vmul.f32 0.2, %v726_v15  ;;  %vm778_vm3 = vcmp.ge.f32.partialorder %v726_v15, 0.0 }
 0x23a   :  { %v947_v14 = vadd.f32 %v946_v13, %v1533_v12 }
 0x23b   :  { %v842_v22 = vsel %vm778_vm3, %v726_v15, %v810_v17 }
 0x23c   :  { %1026 = vst [vmem:[%s1683_s6] sm:$0xff] %v947_v14 }
 0x23e   :  { %v727_v16 = vpop.f32.mrf.mxu2 }
 0x23f   :  { %v728_v18 = vadd.f32 %v727_v16, %v1496_v57 }
 0x241   :  { %v811_v19 = vmul.f32 0.2, %v728_v18  ;;  %v948_v20 = vpop.f32.mrf.mxu3  ;;  %vm779_vm4 = vcmp.ge.f32.partialorder %v728_v18, 0.0 }
 0x242   :  { %v949_v21 = vadd.f32 %v948_v20, %v1533_v12 }
 0x243   :  { %v843_v24 = vsel %vm779_vm4, %v728_v18, %v811_v19 }
 0x244   :  { %1027 = vst [vmem:[%s1683_s6 + $0x8] sm:$0xff] %v949_v21  ;;  %v865_v25 = vpack.c.bf16 %v843_v24, %v842_v22 }
 0x246   :  { %v730_v26 = vpop.f32.mrf.mxu2  ;;  %990 = vmatmul.bf16.gmra.mxu3 %v865_v25 }
 0x247   :  { %v731_v29 = vadd.f32 %v730_v26, %v1496_v57 }
 0x249   :  { %v951_v27 = vpop.f32.mrf.mxu3  ;;  %v812_v31 = vmul.f32 0.2, %v731_v29  ;;  %vm780_vm5 = vcmp.ge.f32.partialorder %v731_v29, 0.0 }
 0x24a   :  { %v952_v28 = vadd.f32 %v951_v27, %v1533_v12 }
 0x24b   :  { %v844_v35 = vsel %vm780_vm5, %v731_v29, %v812_v31 }
 0x24c   :  { %1028 = vst [vmem:[%s1683_s6 + $0x10] sm:$0xff] %v952_v28 }
 0x24e   :  { %v732_v30 = vpop.f32.mrf.mxu2 }
 0x24f   :  { %v733_v32 = vadd.f32 %v732_v30, %v1496_v57 }
 0x251   :  { %v813_v39 = vmul.f32 0.2, %v733_v32  ;;  %v953_v33 = vpop.f32.mrf.mxu3  ;;  %vm781_vm6 = vcmp.ge.f32.partialorder %v733_v32, 0.0 }
 0x252   :  { %v954_v34 = vadd.f32 %v953_v33, %v1533_v12 }
 0x253   :  { %v845_v37 = vsel %vm781_vm6, %v733_v32, %v813_v39 }
 0x254   :  { %1029 = vst [vmem:[%s1683_s6 + $0x18] sm:$0xff] %v954_v34  ;;  %v866_v38 = vpack.c.bf16 %v845_v37, %v844_v35 }
 0x256   :  { %v735_v40 = vpop.f32.mrf.mxu2  ;;  %995 = vmatmul.bf16.gmra.mxu3 %v866_v38 }
 0x257   :  { %v736_v43 = vadd.f32 %v735_v40, %v1496_v57 }
 0x259   :  { %v956_v41 = vpop.f32.mrf.mxu3  ;;  %v814_v45 = vmul.f32 0.2, %v736_v43  ;;  %vm782_vm7 = vcmp.ge.f32.partialorder %v736_v43, 0.0 }
 0x25a   :  { %v957_v42 = vadd.f32 %v956_v41, %v1533_v12 }
 0x25b   :  { %v846_v50 = vsel %vm782_vm7, %v736_v43, %v814_v45 }
 0x25c   :  { %1030 = vst [vmem:[%s1683_s6 + $0x20] sm:$0xff] %v957_v42 }
 0x25e   :  { %v737_v44 = vpop.f32.mrf.mxu2 }
 0x25f   :  { %v738_v46 = vadd.f32 %v737_v44, %v1496_v57 }
 0x261   :  { %v815_v47 = vmul.f32 0.2, %v738_v46  ;;  %v958_v48 = vpop.f32.mrf.mxu3  ;;  %vm783_vm8 = vcmp.ge.f32.partialorder %v738_v46, 0.0 }
 0x262   :  { %v959_v49 = vadd.f32 %v958_v48, %v1533_v12 }
 0x263   :  { %v847_v51 = vsel %vm783_vm8, %v738_v46, %v815_v47 }
 0x264   :  { %1031 = vst [vmem:[%s1683_s6 + $0x28] sm:$0xff] %v959_v49  ;;  %v867_v52 = vpack.c.bf16 %v847_v51, %v846_v50 }
 0x266   :  { %v740_v53 = vpop.f32.mrf.mxu2  ;;  %1000 = vmatmul.bf16.gmra.mxu3 %v867_v52 }
 0x267   :  { %v741_v56 = vadd.f32 %v740_v53, %v1496_v57 }
 0x269   :  { %v961_v54 = vpop.f32.mrf.mxu3  ;;  %v816_v23 = vmul.f32 0.2, %v741_v56  ;;  %vm784_vm9 = vcmp.ge.f32.partialorder %v741_v56, 0.0 }
 0x26a   :  { %v962_v55 = vadd.f32 %v961_v54, %v1533_v12 }
 0x26b   :  { %v848_v63 = vsel %vm784_vm9, %v741_v56, %v816_v23 }
 0x26c   :  { %1032 = vst [vmem:[%s1683_s6 + $0x30] sm:$0xff] %v962_v55 }
 0x26e   :  { %v742_v58 = vpop.f32.mrf.mxu2 }
 0x26f   :  { %v743_v59 = vadd.f32 %v742_v58, %v1496_v57 }
 0x271   :  { %vm785_vm10 = vcmp.ge.f32.partialorder %v743_v59, 0.0  ;;  %v817_v60 = vmul.f32 0.2, %v743_v59  ;;  %v963_v61 = vpop.f32.mrf.mxu3 }
 0x272   :  { %v964_v62 = vadd.f32 %v963_v61, %v1533_v12 }
 0x273   :  { %v849_v0 = vsel %vm785_vm10, %v743_v59, %v817_v60 }
 0x274   :  { %1033 = vst [vmem:[%s1683_s6 + $0x38] sm:$0xff] %v964_v62  ;;  %v868_v1 = vpack.c.bf16 %v849_v0, %v848_v63 }
 0x276   :  { %v745_v2 = vpop.f32.mrf.mxu2  ;;  %1005 = vmatmul.bf16.gmra.mxu3 %v868_v1 }
 0x277   :  { %v746_v36 = vadd.f32 %v745_v2, %v1496_v57 }
 0x279   :  { %v966_v3 = vpop.f32.mrf.mxu3  ;;  %v818_v6 = vmul.f32 0.2, %v746_v36  ;;  %vm786_vm11 = vcmp.ge.f32.partialorder %v746_v36, 0.0 }
 0x27a   :  { %v967_v4 = vadd.f32 %v966_v3, %v1533_v12 }
 0x27b   :  { %v850_v11 = vsel %vm786_vm11, %v746_v36, %v818_v6 }
 0x27c   :  { %1034 = vst [vmem:[%s1683_s6 + $0x40] sm:$0xff] %v967_v4 }
 0x27e   :  { %v747_v5 = vpop.f32.mrf.mxu2 }
 0x27f   :  { %v748_v7 = vadd.f32 %v747_v5, %v1496_v57 }
 0x281   :  { %vm787_vm12 = vcmp.ge.f32.partialorder %v748_v7, 0.0  ;;  %v819_v8 = vmul.f32 0.2, %v748_v7  ;;  %v968_v9 = vpop.f32.mrf.mxu3 }
 0x282   :  { %v969_v10 = vadd.f32 %v968_v9, %v1533_v12 }
 0x283   :  { %v851_v13 = vsel %vm787_vm12, %v748_v7, %v819_v8 }
 0x284   :  { %1035 = vst [vmem:[%s1683_s6 + $0x48] sm:$0xff] %v969_v10  ;;  %v869_v14 = vpack.c.bf16 %v851_v13, %v850_v11 }
 0x286   :  { %v750_v15 = vpop.f32.mrf.mxu2  ;;  %1010 = vmatmul.bf16.gmra.mxu3 %v869_v14 }
 0x287   :  { %v751_v18 = vadd.f32 %v750_v15, %v1496_v57 }
 0x289   :  { %v971_v16 = vpop.f32.mrf.mxu3  ;;  %v820_v20 = vmul.f32 0.2, %v751_v18  ;;  %vm788_vm13 = vcmp.ge.f32.partialorder %v751_v18, 0.0 }
 0x28a   :  { %v972_v17 = vadd.f32 %v971_v16, %v1533_v12 }
 0x28b   :  { %v852_v26 = vsel %vm788_vm13, %v751_v18, %v820_v20 }
 0x28c   :  { %1036 = vst [vmem:[%s1683_s6 + $0x50] sm:$0xff] %v972_v17 }
 0x28e   :  { %v752_v19 = vpop.f32.mrf.mxu2 }
 0x28f   :  { %v753_v21 = vadd.f32 %v752_v19, %v1496_v57 }
 0x291   :  { %vm789_vm14 = vcmp.ge.f32.partialorder %v753_v21, 0.0  ;;  %v821_v22 = vmul.f32 0.2, %v753_v21  ;;  %v973_v24 = vpop.f32.mrf.mxu3 }
 0x292   :  { %v974_v25 = vadd.f32 %v973_v24, %v1533_v12 }
 0x293   :  { %v853_v27 = vsel %vm789_vm14, %v753_v21, %v821_v22 }
 0x294   :  { %1037 = vst [vmem:[%s1683_s6 + $0x58] sm:$0xff] %v974_v25  ;;  %v870_v28 = vpack.c.bf16 %v853_v27, %v852_v26 }
 0x296   :  { %v755_v29 = vpop.f32.mrf.mxu2  ;;  %1015 = vmatmul.bf16.gmra.mxu3 %v870_v28 }
 0x297   :  { %v756_v32 = vadd.f32 %v755_v29, %v1496_v57 }
 0x299   :  { %v976_v30 = vpop.f32.mrf.mxu3  ;;  %v822_v33 = vmul.f32 0.2, %v756_v32  ;;  %vm790_vm15 = vcmp.ge.f32.partialorder %v756_v32, 0.0 }
 0x29a   :  { %v977_v31 = vadd.f32 %v976_v30, %v1533_v12 }
 0x29b   :  { %v854_v40 = vsel %vm790_vm15, %v756_v32, %v822_v33 }
 0x29c   :  { %1038 = vst [vmem:[%s1683_s6 + $0x60] sm:$0xff] %v977_v31 }
 0x29e   :  { %v757_v39 = vpop.f32.mrf.mxu2 }
 0x29f   :  { %v758_v34 = vadd.f32 %v757_v39, %v1496_v57 }
 0x2a1   :  { %vm791_vm1 = vcmp.ge.f32.partialorder %v758_v34, 0.0  ;;  %v823_v35 = vmul.f32 0.2, %v758_v34  ;;  %v978_v37 = vpop.f32.mrf.mxu3 }
 0x2a2   :  { %v979_v38 = vadd.f32 %v978_v37, %v1533_v12 }
 0x2a3   :  { %v855_v41 = vsel %vm791_vm1, %v758_v34, %v823_v35 }
 0x2a4   :  { %1039 = vst [vmem:[%s1683_s6 + $0x68] sm:$0xff] %v979_v38  ;;  %v871_v42 = vpack.c.bf16 %v855_v41, %v854_v40 }
 0x2a6   :  { %1020 = vmatmul.bf16.gmra.mxu3 %v871_v42 }
 0x2a9   :  { %v981_v43 = vpop.f32.mrf.mxu3 }
 0x2aa   :  { %v982_v44 = vadd.f32 %v981_v43, %v1533_v12 }
 0x2ac   :  { %1040 = vst [vmem:[%s1683_s6 + $0x70] sm:$0xff] %v982_v44 }
 0x2b1   :  { %v983_v57 = vpop.f32.mrf.mxu3 }
 0x2b2   :  { %v984_v45 = vadd.f32 %v983_v57, %v1533_v12 }
 0x2b4   :  { %1041 = vst [vmem:[%s1683_s6 + $0x78] sm:$0xff] %v984_v45 }
 0x2b9   :  { %v986_v46 = vpop.f32.mrf.mxu3 }
 0x2ba   :  { %v987_v47 = vadd.f32 %v986_v46, %v1533_v12 }
 0x2bc   :  { %1042 = vst [vmem:[%s1683_s6 + $0x80] sm:$0xff] %v987_v47 }
 0x2c1   :  { %v988_v48 = vpop.f32.mrf.mxu3 }
 0x2c2   :  { %v989_v49 = vadd.f32 %v988_v48, %v1533_v12 }
 0x2c4   :  { %1043 = vst [vmem:[%s1683_s6 + $0x88] sm:$0xff] %v989_v49 }
 0x2c9   :  { %v991_v50 = vpop.f32.mrf.mxu3 }
 0x2ca   :  { %v992_v51 = vadd.f32 %v991_v50, %v1533_v12 }
 0x2cc   :  { %1044 = vst [vmem:[%s1683_s6 + $0x90] sm:$0xff] %v992_v51 }
 0x2d1   :  { %v993_v52 = vpop.f32.mrf.mxu3 }
 0x2d2   :  { %v994_v53 = vadd.f32 %v993_v52, %v1533_v12 }
 0x2d4   :  { %1045 = vst [vmem:[%s1683_s6 + $0x98] sm:$0xff] %v994_v53 }
 0x2d9   :  { %v996_v54 = vpop.f32.mrf.mxu3 }
 0x2da   :  { %v997_v55 = vadd.f32 %v996_v54, %v1533_v12 }
 0x2dc   :  { %1046 = vst [vmem:[%s1683_s6 + $0xa0] sm:$0xff] %v997_v55 }
 0x2e1   :  { %v998_v56 = vpop.f32.mrf.mxu3 }
 0x2e2   :  { %v999_v58 = vadd.f32 %v998_v56, %v1533_v12 }
 0x2e4   :  { %1047 = vst [vmem:[%s1683_s6 + $0xa8] sm:$0xff] %v999_v58 }
 0x2e9   :  { %v1001_v23 = vpop.f32.mrf.mxu3 }
 0x2ea   :  { %v1002_v59 = vadd.f32 %v1001_v23, %v1533_v12 }
 0x2ec   :  { %1048 = vst [vmem:[%s1683_s6 + $0xb0] sm:$0xff] %v1002_v59 }
 0x2f1   :  { %v1003_v60 = vpop.f32.mrf.mxu3 }
 0x2f2   :  { %v1004_v61 = vadd.f32 %v1003_v60, %v1533_v12 }
 0x2f4   :  { %1049 = vst [vmem:[%s1683_s6 + $0xb8] sm:$0xff] %v1004_v61 }
 0x2f9   :  { %v1006_v62 = vpop.f32.mrf.mxu3 }
 0x2fa   :  { %v1007_v63 = vadd.f32 %v1006_v62, %v1533_v12 }
 0x2fc   :  { %1050 = vst [vmem:[%s1683_s6 + $0xc0] sm:$0xff] %v1007_v63 }
 0x301   :  { %v1008_v0 = vpop.f32.mrf.mxu3 }
 0x302   :  { %v1009_v1 = vadd.f32 %v1008_v0, %v1533_v12 }
 0x304   :  { %1051 = vst [vmem:[%s1683_s6 + $0xc8] sm:$0xff] %v1009_v1 }
 0x309   :  { %v1011_v2 = vpop.f32.mrf.mxu3 }
 0x30a   :  { %v1012_v3 = vadd.f32 %v1011_v2, %v1533_v12 }
 0x30c   :  { %1052 = vst [vmem:[%s1683_s6 + $0xd0] sm:$0xff] %v1012_v3 }
 0x311   :  { %v1013_v4 = vpop.f32.mrf.mxu3 }
 0x312   :  { %v1014_v36 = vadd.f32 %v1013_v4, %v1533_v12 }
 0x314   :  { %1053 = vst [vmem:[%s1683_s6 + $0xd8] sm:$0xff] %v1014_v36 }
 0x319   :  { %v1016_v5 = vpop.f32.mrf.mxu3 }
 0x31a   :  { %v1017_v6 = vadd.f32 %v1016_v5, %v1533_v12 }
 0x31c   :  { %1054 = vst [vmem:[%s1683_s6 + $0xe0] sm:$0xff] %v1017_v6 }
 0x321   :  { %v1018_v7 = vpop.f32.mrf.mxu3 }
 0x322   :  { %v1019_v8 = vadd.f32 %v1018_v7, %v1533_v12 }
 0x324   :  { %1055 = vst [vmem:[%s1683_s6 + $0xe8] sm:$0xff] %v1019_v8 }
 0x329   :  { %v1021_v9 = vpop.f32.mrf.mxu3 }
 0x32a   :  { %v1022_v10 = vadd.f32 %v1021_v9, %v1533_v12 }
 0x32c   :  { %1056 = vst [vmem:[%s1683_s6 + $0xf0] sm:$0xff] %v1022_v10 }
 0x331   :  { %v1023_v11 = vpop.f32.mrf.mxu3 }
 0x332   :  { %v1024_v13 = vadd.f32 %v1023_v11, %v1533_v12 }
 0x334   :  { %1057 = vst [vmem:[%s1683_s6 + $0xf8] sm:$0xff] %v1024_v13 }

</bundles_post_ra>
